<compile_context>
chip_gen: v6e
topology: v6e:2x2x1
jax: 0.10.0
libtpu: 0.0.40
codegen_flags: <defaults>
</compile_context>

<pallas_src>
import math

import jax
import jax.numpy as jnp
from jax.experimental import pallas as pl
from jax.experimental.pallas import tpu as pltpu


def _linear_kernel(x_ref, w_ref, b_ref, o_ref):
    # x_ref : (tm, K)   activation rows for this grid step
    # w_ref : (K, N)    weight, already transposed to (in, out), VMEM-resident
    # b_ref : (1, N)    bias row, already float32, VMEM-resident
    # o_ref : (tm, N)   lane-dense output tile (N on the 128-lane axis)
    acc = jnp.dot(
        x_ref[...],
        w_ref[...],
        preferred_element_type=jnp.float32,
        precision=jax.lax.Precision.HIGHEST,
    )
    o_ref[...] = (acc + b_ref[...]).astype(o_ref.dtype)


def _round_up(x, m):
    return ((x + m - 1) // m) * m


def embedder_forward(x, weight, bias, *, tm_max=4096):
    """Embedder.forward.

    x      : (..., vocab_size)
    weight : (d_model, vocab_size)   -- PyTorch nn.Linear weight layout
    bias   : (d_model,)
    returns: (..., d_model)
    """
    *lead, K = x.shape
    N = weight.shape[0]
    M = math.prod(lead) if lead else 1

    x2 = x.reshape(M, K)
    w_t = jnp.transpose(weight)                     # (K, N), tiny one-time fix
    b2 = bias.reshape(1, N).astype(jnp.float32)     # cast hoisted out of kernel

    # Row-tile size: sublane-aligned (multiple of 8), capped at tm_max, and
    # chosen so the parallel grid has >=2 steps when M allows (v7x: 2 TCs).
    tm = min(tm_max, max(8, _round_up(pl.cdiv(M, 2), 8)))
    grid = (pl.cdiv(M, tm),)   # no padding: ragged last block handled by Pallas

    itemsize = jnp.dtype(x.dtype).itemsize
    cost = pl.CostEstimate(
        flops=2 * M * K * N,
        transcendentals=0,
        bytes_accessed=(M * K + K * N + N + M * N) * itemsize,
    )

    out = pl.pallas_call(
        _linear_kernel,
        out_shape=jax.ShapeDtypeStruct((M, N), x.dtype),
        grid=grid,
        in_specs=[
            pl.BlockSpec((tm, K), lambda i: (i, 0)),   # activation rows
            pl.BlockSpec((K, N), lambda i: (0, 0)),    # resident weight
            pl.BlockSpec((1, N), lambda i: (0, 0)),    # resident bias
        ],
        out_specs=pl.BlockSpec((tm, N), lambda i: (i, 0)),
        compiler_params=pltpu.CompilerParams(
            dimension_semantics=("parallel",)),
        cost_estimate=cost,
    )(x2, w_t, b2)

    return out.reshape(*lead, N)


if __name__ == "__main__":
    # Module config: Embedder(vocab_size, d_model)
    vocab_size, d_model = 32, 128
    batch, seq = 2, 8

    key = jax.random.PRNGKey(0)
    k_w, k_b, k_x, k_x2 = jax.random.split(key, 4)

    # PyTorch nn.Linear default init: U(-1/sqrt(fan_in), 1/sqrt(fan_in))
    bound = 1.0 / math.sqrt(vocab_size)
    weight = jax.random.uniform(
        k_w, (d_model, vocab_size), minval=-bound, maxval=bound,
        dtype=jnp.float32)
    bias = jax.random.uniform(
        k_b, (d_model,), minval=-bound, maxval=bound, dtype=jnp.float32)

    # Case 1: (batch, seq, vocab_size), rows divisible by the tile.
    x = jax.random.normal(k_x, (batch, seq, vocab_size), dtype=jnp.float32)
    out = jax.block_until_ready(embedder_forward(x, weight, bias))
    ref = jnp.einsum("bsk,nk->bsn", x, weight,
                     precision=jax.lax.Precision.HIGHEST) + bias
    assert out.shape == ref.shape, f"shape mismatch: {out.shape} vs {ref.shape}"
    assert jnp.allclose(out, ref, atol=1e-3, rtol=1e-3), \
        "Pallas Embedder output does not match reference (case 1)"

    # Case 2: ragged row count (M % tm != 0) — exercises the masked last block.
    x_r = jax.random.normal(k_x2, (3, 5, vocab_size), dtype=jnp.float32)
    out_r = jax.block_until_ready(embedder_forward(x_r, weight, bias))
    ref_r = jnp.einsum("bsk,nk->bsn", x_r, weight,
                       precision=jax.lax.Precision.HIGHEST) + bias
    assert out_r.shape == ref_r.shape, \
        f"shape mismatch: {out_r.shape} vs {ref_r.shape}"
    assert jnp.allclose(out_r, ref_r, atol=1e-3, rtol=1e-3), \
        "Pallas Embedder output does not match reference (case 2, ragged)"

    print("KERNEL_OK")
</pallas_src>

<mosaic_0001>
module attributes {stable_mosaic.version = 11 : i64} {
  func.func @_linear_kernel(%arg0: i32, %arg1: memref<8x32xf32, #tpu.memory_space<vmem>>, %arg2: memref<32x128xf32, #tpu.memory_space<vmem>>, %arg3: memref<1x128xf32, #tpu.memory_space<vmem>>, %arg4: memref<8x128xf32, #tpu.memory_space<vmem>>) attributes {dimension_semantics = [#tpu.dimension_semantics<parallel>], iteration_bounds = array<i64: 2>, scalar_prefetch = 0 : i64, scratch_operands = 0 : i64, tpu.core_type = #tpu.core_type<tc>, window_params = [{transform_indices = @transform_0, window_bounds = array<i64: 8, 32>}, {pipeline_mode = #tpu.pipeline_mode<synchronous>, transform_indices = @transform_1, window_bounds = array<i64: 32, 128>}, {pipeline_mode = #tpu.pipeline_mode<synchronous>, transform_indices = @transform_2, window_bounds = array<i64: 1, 128>}, {transform_indices = @transform_3, window_bounds = array<i64: 8, 128>}]} {
    %c0 = arith.constant 0 : index
    %c0_0 = arith.constant 0 : index
    %0 = vector.load %arg1[%c0, %c0_0] : memref<8x32xf32, #tpu.memory_space<vmem>>, vector<8x32xf32>
    %c0_1 = arith.constant 0 : index
    %c0_2 = arith.constant 0 : index
    %1 = vector.load %arg2[%c0_1, %c0_2] : memref<32x128xf32, #tpu.memory_space<vmem>>, vector<32x128xf32>
    %cst = arith.constant dense<0.000000e+00> : vector<8x128xf32>
    %2 = tpu.matmul %0, %1, %cst {dimension_numbers = #tpu.dot_dimension_numbers<[1], [0], [0], [1], [0, 0, 1, 1], [], []>, precision = #tpu.contract_precision<fp32>} : vector<8x32xf32>, vector<32x128xf32>, vector<8x128xf32> -> vector<8x128xf32>
    %c0_3 = arith.constant 0 : index
    %c0_4 = arith.constant 0 : index
    %3 = vector.load %arg3[%c0_3, %c0_4] : memref<1x128xf32, #tpu.memory_space<vmem>>, vector<1x128xf32>
    %4 = vector.broadcast %3 : vector<1x128xf32> to vector<8x128xf32>
    %5 = arith.addf %2, %4 : vector<8x128xf32>
    %c0_5 = arith.constant 0 : index
    %c0_6 = arith.constant 0 : index
    %6 = vector.load %arg4[%c0_5, %c0_6] : memref<8x128xf32, #tpu.memory_space<vmem>>, vector<8x128xf32>
    tpu.vector_store %arg4[%c0_5, %c0_6], %5 {strides = array<i32>} : memref<8x128xf32, #tpu.memory_space<vmem>>, vector<8x128xf32>,
    return
  }
  func.func @transform_0(%arg0: i32) -> (i32, i32) {
    %c0_i32 = arith.constant 0 : i32
    %c0_i32_0 = arith.constant 0 : i32
    return %arg0, %c0_i32 : i32, i32
  }
  func.func @transform_1(%arg0: i32) -> (i32, i32) {
    %c0_i32 = arith.constant 0 : i32
    %c0_i32_0 = arith.constant 0 : i32
    %c0_i32_1 = arith.constant 0 : i32
    return %c0_i32, %c0_i32_0 : i32, i32
  }
  func.func @transform_2(%arg0: i32) -> (i32, i32) {
    %c0_i32 = arith.constant 0 : i32
    %c0_i32_0 = arith.constant 0 : i32
    %c0_i32_1 = arith.constant 0 : i32
    return %c0_i32, %c0_i32_0 : i32, i32
  }
  func.func @transform_3(%arg0: i32) -> (i32, i32) {
    %c0_i32 = arith.constant 0 : i32
    %c0_i32_0 = arith.constant 0 : i32
    return %arg0, %c0_i32 : i32, i32
  }
}

</mosaic_0001>

<bundles_post_ra>
// kernel: tpu_custom_call.1
= control target key start
LH: loop header
LB: loop body
LE: loop exit
PB: predicated region body
PF: predicated region fallthrough
CT: control target
= control target key end

     0   :  { %8 = vsyncpa [#allocation3], 0  ;;  %s1353_s0 = inlined_call_operand.hbm [shape: f32[16,32], index: 0, kind: input, shape index: {}]   ;;  %s1354_s1 = inlined_call_operand.hbm [shape: f32[32,128], index: 1, kind: input, shape index: {}]   ;;  %s1355_s2 = inlined_call_operand.vmem [shape: f32[1,128], index: 2, kind: input, shape index: {}]   ;;  %s1356_s3 = inlined_call_operand.hbm [shape: f32[16,128], index: 3, kind: output, shape index: {}]  }
   0x1   :  { %10 = vsyncpa [#allocation3 + $0x1], 0 }
   0x2   :  { %11 = vsyncpa [#allocation6], 0 }
   0x3   :  { %12 = vsyncpa [#allocation4], 0 }
   0x4   :  { %14 = vsyncpa [#allocation4 + $0x1], 0  ;;  %s1120_s12 = smov 0   ;;  %s1122_s13 = smov 0  }
   0x5   :  { %s1124_s14 = smov 0   ;;  %s1126_s15 = smov 0  }
   0x6 LB: > { %s1141_s16 = sadd.s32 4294967295, %s1091_s15   ;;  %s797_s17 = sadd.s32 4294967294, %s1091_s15   ;;  %s1091_s15 = sphi %s1126_s15, %s1378_s15   ;;  %s1087_s14 = sphi %s1124_s14, %s1377_s14   ;;  %s1083_s13 = sphi %s1122_s13, %s1376_s13   ;;  %s1079_s12 = sphi %s1120_s12, %s1375_s12  }
   0x7   : > { %p40_p0 = scmp.ne.s32.totalorder %s1083_s13, %s1079_s12  ;;  %p1357_p1 = scmp.eq.s32.totalorder %s1141_s16, 0 }
   0x8   : > { %p112_p3 = scmp.eq.s32.totalorder %s797_s17, 1  ;;  %p798_p5 = scmp.ge.s32.totalorder %s1091_s15, 1 }
   0x9   : > { %p1150_p4 = por %p1357_p1, %p40_p0  ;;  %p119_p7 = scmp.lt.s32.totalorder %s1091_s15, 3 }
   0xa   : > { %p1155_p6 = por %p112_p3, %p40_p0  ;;  %s1093_s21 = smov [#allocation5]  }
   0xb   : > { %s1361_s18 = scalar_select %p1150_p4, 1, 0 }
   0xc   : > { %s1362_s19 = scalar_select %p1155_p6, 1, 0 }
   0xd   : > { %p1160_p8 = pnand %p798_p5, %p119_p7  ;;  %s131_s22 = sshll.u32 %s1093_s21, 4  ;;  %s132_s22 = int_to_ptr.vmem [resolvable:$true] %s131_s22 }
   0xe   : > { %s1174_s24 = sadd.s32 1, %s1091_s15   ;;  %s27_s25 = sadd.s32 1, %s1087_s14 }
   0xf   : > { %s1363_s20 = scalar_select %p1160_p8, 1, 0 }
  0x10   : > { %p916_p9 = pneg %p1160_p8  ;;  %s24_s26 = ssub.s32 %s1091_s15, %s1174_s24 }
  0x11   : > { %s980_s27 = scalar_lea.vmem %s132_s22, 512  ;;  %p988_p5 = scmp.lt.s32.totalorder %s132_s22, %s132_s22 }
  0x12   : > { %p1169_p11 = pnand %p916_p9, %p1357_p1  ;;  %p981_p13 = scmp.ne.s32.totalorder %s132_s22, %s980_s27 }
  0x13   : > { %p989_p7 = scmp.lt.s32.totalorder %s980_s27, %s980_s27 }
  0x14   : > { %p971_p12 = pneg %p1169_p11 }
  0x15   : > { %p990_p10 = por %p989_p7, %p988_p5 }
  0x16   : > { %p983_p0 = pnand %p981_p13, %p971_p12 }
  0x18   : > { %p984_p3 = pneg %p983_p0 }
  0x1a   : > { %p991_p2 = pnand %p990_p10, %p984_p3 }
  0x1c   : > { %994 = shalt.err (!%p991_p2)
}
  0x1d   : > { %s1094_s28 = smov 128   ;;  %s1095_s29 = smov 8  }
  0x1e   : > { %919 = dma.hbm_to_vmem [thread:$0]  (!%p1169_p11), %s1354_s1, 512, %s132_s22, [#allocation6], %s1094_s28, %s1094_s28, %s1095_s29  }
  0x1f   : > { %p25_p9 = scmp.eq.s32.totalorder %s24_s26, 0  ;;  %p34_p12 = scmp.ne.s32.totalorder %s1087_s14, %s1083_s13 }
  0x20   : > { %p35_p10 = scmp.eq.s32.totalorder %s1091_s15, 0  ;;  %p929_p2 = scmp.lt.s32.totalorder %s1091_s15, 2 }
  0x21   : > { %s1191_s5 = scalar_select %p25_p9, %s1087_s14, %s27_s25  }
  0x22   : > { %p36_p13 = por %p35_p10, %p34_p12  ;;  %p1365_p0 = scmp.eq.s32.totalorder %s1141_s16, 1 }
  0x23   : > { %s148_s7 = sand.u32 1, %s1087_s14   ;;  %s802_s8 = sshll.u32 %s1091_s15, 7 }
  0x24   : > { %p1195_p3 = por %p1365_p0, %p34_p12  ;;  %s801_s9 = sshll.u32 %s148_s7, 3 }
  0x25   : > { %s1204_s17 = scalar_lea.hbm %s1353_s0, %s802_s8  ;;  %s152_s21 = scalar_lea.vmem [#allocation2], %s801_s9 }
  0x26   : > { %s1366_s6 = scalar_select %p1195_p3, 1, 0 }
  0x27   : > { %s159_s22 = sshll.u32 %s152_s21, 4  ;;  %p1206_p11 = pnand %p929_p2, %p36_p13  ;;  %s160_s22 = int_to_ptr.vmem [resolvable:$true] %s159_s22 }
  0x28   : > { %s149_s25 = scalar_lea.sflag [#allocation3], %s148_s7  ;;  %s995_s26 = scalar_lea.hbm %s1204_s17, 128 }
  0x29   : > { %p996_p5 = scmp.ne.s32.totalorder %s1204_s17, %s995_s26  ;;  %p997_p7 = pneg %p1206_p11 }
  0x2a   : > { %s1000_s29 = scalar_lea.hbm %s1353_s0, 256  ;;  %p1001_p10 = scmp.lt.s32.totalorder %s1204_s17, %s1353_s0 }
  0x2b   : > { %p998_p9 = pnand %p997_p7, %p996_p5  ;;  %p1002_p2 = scmp.lt.s32.totalorder %s1000_s29, %s995_s26 }
  0x2d   : > { %p999_p12 = pneg %p998_p9  ;;  %p1003_p13 = por %p1002_p2, %p1001_p10 }
  0x2f   : > { %p1004_p0 = pnand %p1003_p13, %p999_p12 }
  0x31   : > { %1007 = shalt.err (!%p1004_p0)
}
  0x32   : > { %s1008_s8 = scalar_lea.vmem %s160_s22, 128  ;;  %s1096_s7 = smov [#allocation2]  }
  0x33   : > { %p1009_p1 = scmp.ne.s32.totalorder %s160_s22, %s1008_s8  ;;  %s1013_s9 = sshll.u32 %s1096_s7, 4  ;;  %s1014_s9 = int_to_ptr.vmem [resolvable:$false] %s1013_s9 }
  0x34   : > { %s1015_s10 = scalar_lea.vmem %s1014_s9, 256  ;;  %p1016_p5 = scmp.lt.s32.totalorder %s160_s22, %s1014_s9 }
  0x35   : > { %p1011_p6 = pnand %p1009_p1, %p997_p7  ;;  %p1017_p9 = scmp.lt.s32.totalorder %s1015_s10, %s1008_s8 }
  0x37   : > { %p1012_p3 = pneg %p1011_p6  ;;  %p1018_p4 = por %p1017_p9, %p1016_p5 }
  0x39   : > { %p1019_p8 = pnand %p1018_p4, %p1012_p3 }
  0x3b   : > { %1022 = shalt.err (!%p1019_p8)
}
  0x3c   : > { %923 = dma.hbm_to_vmem [thread:$0]  (!%p1206_p11), %s1204_s17, 128, %s160_s22, %s149_s25  }
  0x3d   : > { %p1368_p12 = scmp.ne.s32.totalorder %s1363_s20, 0 }
  0x3e   : > { %s1227_s11 = sand.u32 (!%p1368_p12), 1, %s1083_s13   ;;  %p1369_p1 = scmp.ne.s32.totalorder (!%p1368_p12), %s1361_s18, 0 }
  0x3f   : > { %168 = sbr.rel (%p1368_p12) target bundleno = 318 (0x13e), region = 32  ;;  %s804_s21 = sshll.u32 (!%p1368_p12), %s1227_s11, 3 }
  0x40   : > { %s171_s26 = scalar_lea.sflag (!%p1368_p12), [#allocation3], %s1227_s11  ;;  %s174_s27 = scalar_lea.vmem (!%p1368_p12), [#allocation2], %s804_s21 }
  0x44   : > { %1066 = dma.done.wait (%p1369_p1), %s171_s26, 128  }
  0x45   : > { %1068 = vsyncadd (%p1369_p1), %s171_s26, 4294967168  ;;  %p1370_p4 = scmp.eq.s32.totalorder %s1141_s16, 0 }
  0x47   : > { %1070 = dma.done.wait (%p1370_p4), [#allocation6], 512   ;;  %p1371_p6 = pmov %p1370_p4 }
  0x48   : > { %v1097_v0 = vmov 0.0   ;;  %vm1098_vm0 = vmmov 0   ;;  %vm213_vm1 = vcmask 261120   ;;  %v205_v1 = vld [vmem:[#allocation5 + $0x18] sm:$0xff]  ;;  %v204_v2 = vld [vmem:[#allocation5 + $0x10] sm:$0xff]  ;;  %v203_v3 = vld [vmem:[#allocation5 + $0x8] sm:$0xff] }
  0x49   : > { %1072 = vsyncadd (%p1371_p6), [#allocation6], 4294966784  ;;  %842 = vmatprep.subr.mxu0 %v1097_v0  ;;  %853 = vmatprep.subr.mxu1 %v1097_v0  ;;  %v1247_v4 = vand.u32 4294901760, %v205_v1  ;;  %v1249_v5 = vand.u32 4294901760, %v204_v2  ;;  %v1251_v6 = vand.u32 4294901760, %v203_v3  ;;  %v202_v7 = vld [vmem:[#allocation5] sm:$0xff] }
  0x4a   : > { %850 = vmatprep.mubr.msk.f32.mxu0 %vm1098_vm0, %v1097_v0  ;;  %861 = vmatprep.mubr.msk.f32.mxu1 %vm1098_vm0, %v1097_v0  ;;  %v201_v8 = vld [vmem:[%s174_s27] sm:$0xff]  ;;  %v1253_v9 = vand.u32 4294901760, %v202_v7  ;;  %s809_s17 = sshll.u32 %s1141_s16, 7  ;;  %s200_s22 = scalar_lea.vmem [#allocation7], %s804_s21 }
  0x4b   : > { %v215_v10 = vsel %vm213_vm1, %v201_v8, 0  ;;  %843 = vmatpush3.msra.mxu0 %v1247_v4  ;;  %v322_v11 = vsub.f32 %v205_v1, %v1247_v4  ;;  %v329_v13 = vsub.f32 %v204_v2, %v1249_v5  ;;  %v336_v14 = vsub.f32 %v203_v3, %v1251_v6  ;;  %v807_v35 = vld [vmem:[%s1355_s2] ss:$0 sm:$0xff]  ;;  %s717_s23 = sshll.u32 %s200_s22, 4  ;;  %s1316_s29 = scalar_lea.hbm %s1356_s3, %s809_s17  ;;  %s718_s23 = int_to_ptr.vmem [resolvable:$true] %s717_s23 }
  0x4c   : > { %v1257_v12 = vand.u32 4294901760, %v215_v10  ;;  %844 = vmatprep.subr.mxu0 %v1097_v0  ;;  %v343_v15 = vsub.f32 %v202_v7, %v1253_v9  ;;  %s704_s30 = scalar_lea.sflag [#allocation4], %s1227_s11  ;;  %s1023_s4 = scalar_lea.vmem %s718_s23, 128 }
  0x4d   : > { %845 = vmatpush3.msra.mxu0 %v1249_v5  ;;  %v323_v16 = vand.u32 4294901760, %v322_v11  ;;  %v330_v18 = vand.u32 4294901760, %v329_v13  ;;  %v337_v19 = vand.u32 4294901760, %v336_v14  ;;  %p1024_p8 = scmp.ne.s32.totalorder %s718_s23, %s1023_s4  ;;  %p1372_p3 = scmp.ne.s32.totalorder %s1366_s6, 0 }
  0x4e   : > { %v287_v17 = vsub.f32 %v215_v10, %v1257_v12  ;;  %846 = vmatprep.subr.mxu0 %v1097_v0  ;;  %v344_v20 = vand.u32 4294901760, %v343_v15  ;;  %s1099_s16 = smov [#allocation7]  }
  0x4f   : > { %847 = vmatpush3.msra.mxu0 %v1251_v6  ;;  %v324_v21 = vsub.f32 %v322_v11, %v323_v16  ;;  %v331_v23 = vsub.f32 %v329_v13, %v330_v18  ;;  %v338_v24 = vsub.f32 %v336_v14, %v337_v19  ;;  %p1025_p11 = pnand %p1024_p8, %p1372_p3  ;;  %s1027_s8 = sshll.u32 %s1099_s16, 4  ;;  %s1028_s8 = int_to_ptr.vmem [resolvable:$false] %s1027_s8 }
  0x50   : > { %v288_v22 = vand.u32 4294901760, %v287_v17  ;;  %848 = vmatprep.subr.mxu0 %v1097_v0  ;;  %v345_v28 = vsub.f32 %v343_v15, %v344_v20  ;;  %s1029_s7 = scalar_lea.vmem %s1028_s8, 256  ;;  %p1030_p10 = scmp.lt.s32.totalorder %s718_s23, %s1028_s8 }
  0x51   : > { %849 = vmatpush3.msra.mxu0 %v1253_v9  ;;  %v325_v25 = vand.u32 4294901760, %v324_v21  ;;  %v332_v27 = vand.u32 4294901760, %v331_v23  ;;  %v339_v30 = vand.u32 4294901760, %v338_v24  ;;  %p1026_p7 = pneg %p1025_p11  ;;  %p1031_p2 = scmp.lt.s32.totalorder %s1029_s7, %s1023_s4 }
  0x52   : > { %v289_v26 = vsub.f32 %v287_v17, %v288_v22  ;;  %864 = vmatprep.subr.mxu0 %v1097_v0  ;;  %v346_v31 = vand.u32 4294901760, %v345_v28 }
  0x53   : > { %854 = vmatpush3.msra.mxu1 %v325_v25  ;;  %p1032_p13 = por %p1031_p2, %p1030_p10 }
  0x54   : > { %v290_v29 = vand.u32 4294901760, %v289_v26  ;;  %855 = vmatprep.subr.mxu1 %v1097_v0 }
  0x55   : > { %856 = vmatpush3.msra.mxu1 %v332_v27  ;;  %p1033_p0 = pnand %p1032_p13, %p1026_p7 }
  0x56   : > { %851 = vmatmul.mubr.f32.vlgmr.msra.gmra.mxu0 %v290_v29  ;;  %857 = vmatprep.subr.mxu1 %v1097_v0 }
  0x57   : > { %865 = vmatpush3.msra.mxu0 %v322_v11  ;;  %858 = vmatpush3.msra.mxu1 %v339_v30 }
  0x58   : > { %866 = vmatprep.subr.mxu0 %v1097_v0  ;;  %859 = vmatprep.subr.mxu1 %v1097_v0 }
  0x59   : > { %867 = vmatpush3.msra.mxu0 %v329_v13  ;;  %860 = vmatpush3.msra.mxu1 %v346_v31 }
  0x5a   : > { %868 = vmatprep.subr.mxu0 %v1097_v0  ;;  %862 = vmatmul.mubr.f32.vlgmr.msra.gmra.mxu1 %v1257_v12 }
  0x5b   : > { %869 = vmatpush3.msra.mxu0 %v336_v14  ;;  %875 = vmatprep.subr.mxu1 %v1097_v0 }
  0x5c   : > { %870 = vmatprep.subr.mxu0 %v1097_v0  ;;  %876 = vmatpush3.msra.mxu1 %v1247_v4 }
  0x5d   : > { %871 = vmatpush3.msra.mxu0 %v343_v15  ;;  %872 = vmatprep.mubr.msk.f32.mxu0 %vm1098_vm0, %v1097_v0 }
  0x5e   : > { %877 = vmatprep.subr.mxu1 %v1097_v0  ;;  %886 = vmatprep.subr.mxu0 %v1097_v0 }
  0x5f   : > { %873 = vmatmul.mubr.f32.vlgmr.msra.gmra.mxu0 %v287_v17  ;;  %878 = vmatpush3.msra.mxu1 %v1249_v5 }
  0x60   : > { %887 = vmatpush3.msra.mxu0 %v323_v16  ;;  %879 = vmatprep.subr.mxu1 %v1097_v0 }
  0x61   : > { %888 = vmatprep.subr.mxu0 %v1097_v0  ;;  %880 = vmatpush3.msra.mxu1 %v1251_v6 }
  0x62   : > { %889 = vmatpush3.msra.mxu0 %v330_v18  ;;  %881 = vmatprep.subr.mxu1 %v1097_v0 }
  0x63   : > { %890 = vmatprep.subr.mxu0 %v1097_v0  ;;  %882 = vmatpush3.msra.mxu1 %v1253_v9 }
  0x64   : > { %883 = vmatprep.mubr.msk.f32.mxu1 %vm1098_vm0, %v1097_v0  ;;  %891 = vmatpush3.msra.mxu0 %v337_v19 }
  0x65   : > { %884 = vmatmul.mubr.f32.vlgmr.msra.gmra.mxu1 %v288_v22  ;;  %892 = vmatprep.subr.mxu0 %v1097_v0 }
  0x66   : > { %897 = vmatprep.subr.mxu1 %v1097_v0  ;;  %893 = vmatpush3.msra.mxu0 %v344_v20 }
  0x67   : > { %894 = vmatprep.mubr.msk.f32.mxu0 %vm1098_vm0, %v1097_v0  ;;  %898 = vmatpush3.msra.mxu1 %v1247_v4 }
  0x68   : > { %895 = vmatmul.mubr.f32.vlgmr.msra.gmra.mxu0 %v1257_v12  ;;  %899 = vmatprep.subr.mxu1 %v1097_v0 }
  0x69   : > { %905 = vmatprep.mubr.msk.f32.mxu1 %vm1098_vm0, %v1097_v0  ;;  %900 = vmatpush3.msra.mxu1 %v1249_v5 }
  0x6a   : > { %901 = vmatprep.subr.mxu1 %v1097_v0 }
  0x6b   : > { %902 = vmatpush3.msra.mxu1 %v1251_v6 }
  0x6c   : > { %903 = vmatprep.subr.mxu1 %v1097_v0 }
  0x6d   : > { %904 = vmatpush3.msra.mxu1 %v1253_v9 }
  0x6e   : > { %906 = vmatmul.mubr.f32.vlgmr.msra.gmra.mxu1 %v1257_v12 }
 0x116   : > { %v292_v32 = vpop.f32.mrf.mxu0 }
 0x117   : > { %v293_v38 = vadd.f32 %v807_v35, %v292_v32 }
 0x118   : > { %v852_v33 = vpop.f32.mrf.mxu0 }
 0x11a   : > { %v383_v34 = vpop.f32.mrf.mxu1 }
 0x11b   : > { %v384_v40 = vadd.f32 %v383_v34, %v293_v38 }
 0x11c   : > { %v863_v36 = vpop.f32.mrf.mxu1 }
 0x11f   : > { %v463_v37 = vpop.f32.mrf.mxu0 }
 0x120   : > { %v464_v43 = vadd.f32 %v463_v37, %v384_v40 }
 0x121   : > { %v874_v39 = vpop.f32.mrf.mxu0 }
 0x125   : > { %v540_v41 = vpop.f32.mrf.mxu1 }
 0x126   : > { %v541_v45 = vadd.f32 %v540_v41, %v464_v43 }
 0x127   : > { %v885_v42 = vpop.f32.mrf.mxu1 }
 0x128   : > { %v623_v44 = vpop.f32.mrf.mxu0 }
 0x129   : > { %v624_v47 = vadd.f32 %v623_v44, %v541_v45 }
 0x12a   : > { %v896_v46 = vpop.f32.mrf.mxu0 }
 0x12e   : > { %v698_v48 = vpop.f32.mrf.mxu1 }
 0x12f   : > { %v699_v49 = vadd.f32 %v698_v48, %v624_v47 }
 0x130   : > { %v907_v50 = vpop.f32.mrf.mxu1 }
 0x131   : > { %702 = vst [vmem:[%s200_s22] sm:$0xff] %v699_v49 }
 0x132   : > { %1036 = shalt.err (!%p1033_p0)
}
 0x133   : > { %s1037_s9 = scalar_lea.hbm %s1316_s29, 128  ;;  %s1041_s21 = scalar_lea.hbm %s1356_s3, 256 }
 0x134   : > { %p1038_p5 = scmp.ne.s32.totalorder %s1316_s29, %s1037_s9  ;;  %p1042_p1 = scmp.lt.s32.totalorder %s1316_s29, %s1356_s3 }
 0x135   : > { %p1043_p4 = scmp.lt.s32.totalorder %s1041_s21, %s1037_s9 }
 0x136   : > { %p1039_p9 = pnand %p1038_p5, %p1372_p3 }
 0x137   : > { %p1044_p6 = por %p1043_p4, %p1042_p1 }
 0x138   : > { %p1040_p12 = pneg %p1039_p9 }
 0x13a   : > { %p1045_p8 = pnand %p1044_p6, %p1040_p12 }
 0x13c   : > { %1048 = shalt.err (!%p1045_p8)
}
 0x13d   : > { %914 = dma.vmem_to_hbm [thread:$0]  (%p1372_p3), %s718_s23, 128, %s1316_s29, %s704_s30  }
 0x13e PF: > { %s729_s18 = sand.u32 1, %s1079_s12   ;;  %p1373_p11 = scmp.ne.s32.totalorder %s1362_s19, 0 }
 0x13f   : > { %p1374_p7 = scmp.ge.s32.totalorder %s1091_s15, 2  ;;  %s730_s20 = scalar_lea.sflag [#allocation4], %s729_s18 }
 0x141   : > { %p925_p10 = pnand %p1374_p7, %p1373_p11 }
 0x143   : > { %p926_p2 = pneg %p925_p10 }
 0x145   : > { %1074 = dma.done.wait (%p926_p2), %s730_s20, 128  }
 0x146   : > { %1076 = vsyncadd (%p926_p2), %s730_s20, 4294967168  ;;  %p17_p13 = scmp.ge.s32.totalorder %s1174_s24, 4   ;;  %s1375_s12 = smov %s1083_s13 }
 0x147   : > { %s1376_s13 = smov %s1087_s14  ;;  %s1377_s14 = smov %s1191_s5 }
 0x148   : > { %s1378_s15 = smov %s1174_s24  ;;  %19 = sbr.rel (!%p17_p13) target bundleno = 6 (0x6), region = 81 }
 0x14d   :  { %735 = vsyncpa [#allocation3], 1 }
 0x14e   :  { %737 = vsyncpa [#allocation3 + $0x1], 1 }
 0x14f   :  { %738 = vsyncpa [#allocation6], 1 }
 0x150   :  { %739 = vsyncpa [#allocation4], 1 }
 0x151   :  { %741 = vsyncpa [#allocation4 + $0x1], 1 }

</bundles_post_ra>
